<compile_context>
chip_gen: v7x
topology: tpu7x:2x2x1
jax: 0.10.0
libtpu: 0.0.40
codegen_flags: <defaults>
</compile_context>

<pallas_src>
import functools

import jax
import jax.numpy as jnp
from jax.experimental import pallas as pl
from jax.experimental.pallas import tpu as pltpu


def dense_layer_kernel(x_ref, w1t_ref, b1_ref, w2t_ref, b2_ref, o_ref):
    """o = concat(x, relu(relu(x @ w1t + b1) @ w2t + b2)) for one batch tile.

    w1t: (F, G), w2t: (G, G) already transposed in the wrapper -> canonical
    (row, contraction) x (contraction, col) MXU feed, no in-kernel transpose.
    """
    x = x_ref[...]                                                   # (tb, F)
    h = jnp.dot(x, w1t_ref[...], preferred_element_type=jnp.float32)  # (tb, G)
    h = jnp.maximum(h + b1_ref[...], 0.0)
    o = jnp.dot(h, w2t_ref[...], preferred_element_type=jnp.float32)  # (tb, G)
    o = jnp.maximum(o + b2_ref[...], 0.0)
    # Single full-block store of the concatenated row (x passthrough + new feats).
    o_ref[...] = jnp.concatenate(
        [x.astype(o_ref.dtype), o.astype(o_ref.dtype)], axis=1)


def _round_up(v, m):
    return ((v + m - 1) // m) * m


@functools.partial(jax.jit, static_argnames=("tile_b",))
def dense_layer(x, w1, b1, w2, b2, *, tile_b=8192):
    """x: (B, F); w1: (G, F); b1: (G,); w2: (G, G); b2: (G,) -> (B, F+G)."""
    B, F = x.shape
    G = w1.shape[0]
    Fo = F + G

    # Batch tile: large (amortize per-step overhead), multiple of 8, but keep
    # >= 2 grid steps when possible so the 'parallel' axis feeds both v7x TCs.
    tb = min(tile_b, max(8, _round_up(pl.cdiv(B, 2), 8)))
    tb = min(tb, _round_up(B, 8))
    num_tiles = pl.cdiv(B, tb)

    # One-off weight prep (tiny, effectively free under jit).
    w1t = w1.T                    # (F, G)
    w2t = w2.T                    # (G, G)
    b1_r = b1.reshape(1, G)
    b2_r = b2.reshape(1, G)

    itemsize = x.dtype.itemsize
    cost = pl.CostEstimate(
        flops=2 * B * F * G + 2 * B * G * G,
        transcendentals=0,
        bytes_accessed=(B * F + F * G + G * G + 2 * G + B * Fo) * itemsize,
    )

    # Double-buffered per-step VMEM footprint; raise the scoped-VMEM cap only
    # when it would blow past the small v5e default (16 MiB).
    stream_bytes = 2 * (tb * F + tb * Fo) * itemsize
    weight_bytes = 2 * (F * G + G * G + 2 * G) * itemsize
    needed = stream_bytes + weight_bytes
    cp_kwargs = dict(dimension_semantics=("parallel",))
    if needed > (14 << 20):
        cp_kwargs["vmem_limit_bytes"] = min(int(needed * 1.5), 100 << 20)

    return pl.pallas_call(
        dense_layer_kernel,
        out_shape=jax.ShapeDtypeStruct((B, Fo), x.dtype),
        grid=(num_tiles,),
        in_specs=[
            pl.BlockSpec((tb, F), lambda i: (i, 0)),   # x batch tile
            pl.BlockSpec((F, G), lambda i: (0, 0)),    # w1t resident
            pl.BlockSpec((1, G), lambda i: (0, 0)),    # b1 resident
            pl.BlockSpec((G, G), lambda i: (0, 0)),    # w2t resident
            pl.BlockSpec((1, G), lambda i: (0, 0)),    # b2 resident
        ],
        out_specs=pl.BlockSpec((tb, Fo), lambda i: (i, 0)),  # concat written in-kernel
        compiler_params=pltpu.CompilerParams(**cp_kwargs),
        cost_estimate=cost,
    )(x, w1t, b1_r, w2t, b2_r)


def dense_layer_ref(x, w1, b1, w2, b2):
    h = jnp.maximum(x @ w1.T + b1, 0.0)
    o = jnp.maximum(h @ w2.T + b2, 0.0)
    return jnp.concatenate([x, o], axis=1)


if __name__ == "__main__":
    in_features = 32
    growth_rate = 16
    batch = 8

    key = jax.random.PRNGKey(0)
    kx, k1, k2, k3, k4 = jax.random.split(key, 5)

    x = jax.random.normal(kx, (batch, in_features), dtype=jnp.float32)

    # Deterministic parameter init (uniform, Kaiming-like bound as in nn.Linear).
    bound1 = 1.0 / jnp.sqrt(in_features)
    bound2 = 1.0 / jnp.sqrt(growth_rate)
    w1 = jax.random.uniform(k1, (growth_rate, in_features), jnp.float32, -bound1, bound1)
    b1 = jax.random.uniform(k2, (growth_rate,), jnp.float32, -bound1, bound1)
    w2 = jax.random.uniform(k3, (growth_rate, growth_rate), jnp.float32, -bound2, bound2)
    b2 = jax.random.uniform(k4, (growth_rate,), jnp.float32, -bound2, bound2)

    out = dense_layer(x, w1, b1, w2, b2)
    out = jax.block_until_ready(out)

    ref = dense_layer_ref(x, w1, b1, w2, b2)
    assert out.shape == (batch, in_features + growth_rate)
    assert jnp.allclose(out, ref, atol=1e-5, rtol=1e-5)

    print("KERNEL_OK")
</pallas_src>

<mosaic_0001>
module attributes {stable_mosaic.version = 11 : i64} {
  func.func @dense_layer_kernel(%arg0: i32, %arg1: memref<8x32xf32, #tpu.memory_space<vmem>>, %arg2: memref<32x16xf32, #tpu.memory_space<vmem>>, %arg3: memref<1x16xf32, #tpu.memory_space<vmem>>, %arg4: memref<16x16xf32, #tpu.memory_space<vmem>>, %arg5: memref<1x16xf32, #tpu.memory_space<vmem>>, %arg6: memref<8x48xf32, #tpu.memory_space<vmem>>) attributes {dimension_semantics = [#tpu.dimension_semantics<parallel>], iteration_bounds = array<i64: 1>, scalar_prefetch = 0 : i64, scratch_operands = 0 : i64, tpu.core_type = #tpu.core_type<tc>, window_params = [{transform_indices = @transform_0, window_bounds = array<i64: 8, 32>}, {pipeline_mode = #tpu.pipeline_mode<synchronous>, transform_indices = @transform_1, window_bounds = array<i64: 32, 16>}, {pipeline_mode = #tpu.pipeline_mode<synchronous>, transform_indices = @transform_2, window_bounds = array<i64: 1, 16>}, {pipeline_mode = #tpu.pipeline_mode<synchronous>, transform_indices = @transform_3, window_bounds = array<i64: 16, 16>}, {pipeline_mode = #tpu.pipeline_mode<synchronous>, transform_indices = @transform_4, window_bounds = array<i64: 1, 16>}, {transform_indices = @transform_5, window_bounds = array<i64: 8, 48>}]} {
    %c0 = arith.constant 0 : index
    %c0_0 = arith.constant 0 : index
    %0 = vector.load %arg1[%c0, %c0_0] : memref<8x32xf32, #tpu.memory_space<vmem>>, vector<8x32xf32>
    %c0_1 = arith.constant 0 : index
    %c0_2 = arith.constant 0 : index
    %1 = vector.load %arg2[%c0_1, %c0_2] : memref<32x16xf32, #tpu.memory_space<vmem>>, vector<32x16xf32>
    %cst = arith.constant dense<0.000000e+00> : vector<8x16xf32>
    %2 = tpu.matmul %0, %1, %cst {dimension_numbers = #tpu.dot_dimension_numbers<[1], [0], [0], [1], [0, 0, 1, 1], [], []>} : vector<8x32xf32>, vector<32x16xf32>, vector<8x16xf32> -> vector<8x16xf32>
    %c0_3 = arith.constant 0 : index
    %c0_4 = arith.constant 0 : index
    %3 = vector.load %arg3[%c0_3, %c0_4] : memref<1x16xf32, #tpu.memory_space<vmem>>, vector<1x16xf32>
    %4 = vector.broadcast %3 : vector<1x16xf32> to vector<8x16xf32>
    %5 = arith.addf %2, %4 : vector<8x16xf32>
    %cst_5 = arith.constant 0.000000e+00 : f32
    %6 = vector.broadcast %cst_5 : f32 to vector<8x16xf32>
    %7 = arith.maximumf %5, %6 : vector<8x16xf32>
    %c0_6 = arith.constant 0 : index
    %c0_7 = arith.constant 0 : index
    %8 = vector.load %arg4[%c0_6, %c0_7] : memref<16x16xf32, #tpu.memory_space<vmem>>, vector<16x16xf32>
    %cst_8 = arith.constant dense<0.000000e+00> : vector<8x16xf32>
    %9 = tpu.matmul %7, %8, %cst_8 {dimension_numbers = #tpu.dot_dimension_numbers<[1], [0], [0], [1], [0, 0, 1, 1], [], []>} : vector<8x16xf32>, vector<16x16xf32>, vector<8x16xf32> -> vector<8x16xf32>
    %c0_9 = arith.constant 0 : index
    %c0_10 = arith.constant 0 : index
    %10 = vector.load %arg5[%c0_9, %c0_10] : memref<1x16xf32, #tpu.memory_space<vmem>>, vector<1x16xf32>
    %11 = vector.broadcast %10 : vector<1x16xf32> to vector<8x16xf32>
    %12 = arith.addf %9, %11 : vector<8x16xf32>
    %cst_11 = arith.constant 0.000000e+00 : f32
    %13 = vector.broadcast %cst_11 : f32 to vector<8x16xf32>
    %14 = arith.maximumf %12, %13 : vector<8x16xf32>
    %15 = tpu.concatenate %0, %14 in 1 : vector<8x32xf32>, vector<8x16xf32> -> vector<8x48xf32>
    %c0_12 = arith.constant 0 : index
    %c0_13 = arith.constant 0 : index
    %16 = vector.load %arg6[%c0_12, %c0_13] : memref<8x48xf32, #tpu.memory_space<vmem>>, vector<8x48xf32>
    tpu.vector_store %arg6[%c0_12, %c0_13], %15 {strides = array<i32>} : memref<8x48xf32, #tpu.memory_space<vmem>>, vector<8x48xf32>,
    return
  }
  func.func @transform_0(%arg0: i32) -> (i32, i32) {
    %c0_i32 = arith.constant 0 : i32
    %c0_i32_0 = arith.constant 0 : i32
    return %arg0, %c0_i32 : i32, i32
  }
  func.func @transform_1(%arg0: i32) -> (i32, i32) {
    %c0_i32 = arith.constant 0 : i32
    %c0_i32_0 = arith.constant 0 : i32
    %c0_i32_1 = arith.constant 0 : i32
    return %c0_i32, %c0_i32_0 : i32, i32
  }
  func.func @transform_2(%arg0: i32) -> (i32, i32) {
    %c0_i32 = arith.constant 0 : i32
    %c0_i32_0 = arith.constant 0 : i32
    %c0_i32_1 = arith.constant 0 : i32
    return %c0_i32, %c0_i32_0 : i32, i32
  }
  func.func @transform_3(%arg0: i32) -> (i32, i32) {
    %c0_i32 = arith.constant 0 : i32
    %c0_i32_0 = arith.constant 0 : i32
    %c0_i32_1 = arith.constant 0 : i32
    return %c0_i32, %c0_i32_0 : i32, i32
  }
  func.func @transform_4(%arg0: i32) -> (i32, i32) {
    %c0_i32 = arith.constant 0 : i32
    %c0_i32_0 = arith.constant 0 : i32
    %c0_i32_1 = arith.constant 0 : i32
    return %c0_i32, %c0_i32_0 : i32, i32
  }
  func.func @transform_5(%arg0: i32) -> (i32, i32) {
    %c0_i32 = arith.constant 0 : i32
    %c0_i32_0 = arith.constant 0 : i32
    return %arg0, %c0_i32 : i32, i32
  }
}

</mosaic_0001>

<bundles_post_ra>
// kernel: dense_layer.1
= control target key start
LH: loop header
LB: loop body
LE: loop exit
PB: predicated region body
PF: predicated region fallthrough
CT: control target
= control target key end

     0   :  { %v281_v3 = vmov 0.0|0.0   ;;  %vm282_vm0 = vmmov 0   ;;  %v283_v6 = vmov 0.0   ;;  %s357_s0 = inlined_call_operand.vmem [shape: f32[8,32], index: 0, kind: input, shape index: {}]   ;;  %s358_s1 = inlined_call_operand.vmem [shape: f32[32,16], index: 1, kind: input, shape index: {}]   ;;  %s359_s2 = inlined_call_operand.vmem [shape: f32[1,16], index: 2, kind: input, shape index: {}]   ;;  %s360_s3 = inlined_call_operand.vmem [shape: f32[16,16], index: 3, kind: input, shape index: {}]   ;;  %s361_s4 = inlined_call_operand.vmem [shape: f32[1,16], index: 4, kind: input, shape index: {}]   ;;  %s362_s5 = inlined_call_operand.hbm [shape: f32[8,48], index: 5, kind: output, shape index: {}]  }
   0x1   :  { %v22_v0 = vld [vmem:[%s358_s1] sm:$0xff]  ;;  %v23_v1 = vld [vmem:[%s358_s1 + $0x8] sm:$0xff]  ;;  %v24_v2 = vld [vmem:[%s358_s1 + $0x10] sm:$0xff]  ;;  %243 = vmatprep.subr.bf16.mxu0 %v281_v3  ;;  %233 = vmatprep.mubr.msk.f32.mxu0 %vm282_vm0, %v283_v6 }
   0x2   :  { %v244_v4 = vpack.c.bf16 %v23_v1, %v22_v0  ;;  %v25_v5 = vld [vmem:[%s358_s1 + $0x18] sm:$0xff]  ;;  %249 = vmatprep.subr.bf16.mxu1 %v281_v3  ;;  %240 = vmatprep.mubr.msk.f32.mxu1 %vm282_vm0, %v283_v6 }
   0x3   :  { %10 = vsyncpa [#allocation3], 0  ;;  %v247_v7 = vpack.c.bf16 %v25_v5, %v24_v2  ;;  %v21_v8 = vld [vmem:[%s357_s0] sm:$0xff]  ;;  %vm33_vm1 = vcmask 261120   ;;  %v109_v10 = vld [vmem:[%s360_s3 + $0x8] sm:$0xff]  ;;  %vm117_vm2 = vcmask 130048  }
   0x4   :  { %245 = vmatpush3.bf16.msra.mxu0 %v244_v4  ;;  %v108_v9 = vld [vmem:[%s360_s3] sm:$0xff]  ;;  %s284_s3 = smov 32   ;;  %s285_s9 = smov [#allocation2]   ;;  %vm197_vm3 = vcmask 392192  }
   0x5   :  { %246 = vmatprep.subr.bf16.mxu0 %v281_v3  ;;  %v250_v11 = vpack.c.bf16 %v109_v10, %v108_v9  ;;  %v213_v12 = vld [vmem:[%s359_s2] ss:$0 sm:$0xff]  ;;  %s205_s10 = sshll.u32 %s285_s9, 4  ;;  %s206_s10 = int_to_ptr.vmem [resolvable:$true] %s205_s10 }
   0x6   :  { %v215_v17 = vld [vmem:[%s361_s4] ss:$0 sm:$0xff]  ;;  %s257_s2 = scalar_lea.vmem %s206_s10, 128  ;;  %p262_p1 = scmp.lt.s32.totalorder %s206_s10, %s206_s10 }
   0x7   :  { %251 = vmatpush3.bf16.msra.mxu1 %v250_v11  ;;  %p258_p0 = scmp.ne.s32.totalorder %s206_s10, %s257_s2  ;;  %p263_p2 = scmp.lt.s32.totalorder %s257_s2, %s257_s2 }
   0x8   :  { %248 = vmatpush3.bf16.msra.mxu0 %v247_v7 }
   0x9   :  { %p264_p3 = por %p263_p2, %p262_p1 }
   0xb   :  { %234 = vmatmul.mubr.msk.f32.vlgmr.msra.gmra.mrb[0].mxu0 %vm33_vm1, %v21_v8  ;;  %p265_p4 = pnand %p264_p3, %p258_p0 }
  0xde   :  { %v103_v13 = vpop.f32.mrb[0].mxu0 }
  0xdf   :  { %v104_v14 = vadd.f32 %v213_v12, %v103_v13  ;;  %v235_v15 = vpop.f32.mrb[1].mxu0 }
  0xe1   :  { %v107_v16 = vmax.f32 %v104_v14, 0.0 }
  0xe3   :  { %241 = vmatmul.mubr.msk.f32.vlgmr.msra.gmra.mrb[0].mxu1 %vm117_vm2, %v107_v16 }
 0x1b6   :  { %v187_v18 = vpop.f32.mrb[0].mxu1 }
 0x1b7   :  { %v188_v19 = vadd.f32 %v215_v17, %v187_v18  ;;  %v242_v20 = vpop.f32.mrb[1].mxu1 }
 0x1b9   :  { %v191_v21 = vmax.f32 %v188_v19, 0.0 }
 0x1bb   :  { %193 = vrot.lane.b32.xlu0 %v191_v21, %s284_s3 }
 0x22d   :  { %v194_v22 = vpop.permute.xlu0 %193 }
 0x22e   :  { %v196_v23 = vsel %vm33_vm1, %v21_v8, %v194_v22 }
 0x22f   :  { %198 = vst.msk [vmem:[#allocation2] sm:$0xff] %vm197_vm3, %v196_v23 }
 0x230   :  { %268 = shalt.err (!%p265_p4)
}
 0x231   :  { %s269_s12 = scalar_lea.hbm %s362_s5, 128 }
 0x232   :  { %p270_p5 = scmp.ne.s32.totalorder %s362_s5, %s269_s12  ;;  %p273_p6 = scmp.lt.u32.totalorder %s269_s12, %s362_s5 }
 0x234   :  { %p275_p7 = pnand %p273_p6, %p270_p5 }
 0x236   :  { %278 = shalt.err (!%p275_p7)
}
 0x237   :  { %208 = dma.vmem_to_hbm [thread:$0]  %s206_s10, 128, %s362_s5, [#allocation3]  }
 0x238   :  { %279 = dma.done.wait [#allocation3], 128  }
 0x239   :  { %280 = vsyncadd [#allocation3], 4294967168 }
 0x23a   :  { %212 = vsyncpa [#allocation3], 1 }

</bundles_post_ra>
